<compile_context>
chip_gen: v7x
topology: tpu7x:2x2x1
jax: 0.10.0
libtpu: 0.0.40
codegen_flags: <defaults>
</compile_context>

<pallas_src>
import functools

import jax
import jax.numpy as jnp
from jax.experimental import pallas as pl
from jax.experimental.pallas import tpu as pltpu


_VMEM_LIMIT = 48 * 1024 * 1024        # safe on v5e/v6e (128 MiB) and v7x (64 MiB)


def _compiler_params(semantics):
    return pltpu.CompilerParams(dimension_semantics=semantics,
                                vmem_limit_bytes=_VMEM_LIMIT)


def _sigmoid(x):
    # exp and reciprocal both run on the otherwise-idle EUP slot; avoids the
    # f32 VALU divide of a hand-rolled sigmoid.
    return pl.reciprocal(1.0 + jnp.exp(-x), approx=True)


def _choose_tm(M, per_row_bytes, budget_bytes=8 * 1024 * 1024):
    """Tile size along M so double-buffered tiles stay well inside VMEM."""
    if M <= 1024:
        return M
    tm = budget_bytes // (2 * per_row_bytes)
    tm = min(M, max(8, (tm // 8) * 8))
    return min(tm, 2048)


# ----------------------------------------------------------------------------
# Pallas kernels
# ----------------------------------------------------------------------------
def _conv3x3_row_kernel(x0_ref, x1_ref, x2_ref, w_ref, b_ref, o_ref, *, d_rate):
    # x{dy}_ref: (1, Wp, Cin) bf16 rows of the padded input at vertical tap dy
    # w_ref: (9, Cin, Cout) bf16, b_ref: (1, Cout) f32, o_ref: (1, W, Cout) f32
    W = o_ref.shape[1]
    Cout = o_ref.shape[2]
    xs = (x0_ref, x1_ref, x2_ref)
    acc = jnp.zeros((W, Cout), jnp.float32)
    for dy in range(3):
        for dx in range(3):
            sl = xs[dy][0, pl.ds(dx * d_rate, W), :]          # (W, Cin) bf16
            acc = acc + jnp.dot(sl, w_ref[dy * 3 + dx],
                                preferred_element_type=jnp.float32)
    acc = acc + b_ref[...]
    o_ref[0] = jnp.maximum(acc, 0.0)


def _msc_kernel(x_ref, u2_ref, u4_ref, w0_ref, w1_ref, w2_ref, b_ref, o_ref):
    # 1x1 conv over concat([x, up2, up4], channel) without the concat:
    # three (TM, C) bf16 inputs x three (C, C) bf16 weight slices, f32 acc.
    acc = jnp.dot(x_ref[...], w0_ref[...], preferred_element_type=jnp.float32)
    acc = acc + jnp.dot(u2_ref[...], w1_ref[...], preferred_element_type=jnp.float32)
    acc = acc + jnp.dot(u4_ref[...], w2_ref[...], preferred_element_type=jnp.float32)
    acc = acc + b_ref[...]
    o_ref[...] = jnp.maximum(acc, 0.0)


def _fuse_stage1_kernel(rgbm_ref, tm_ref, sm_ref, sh_ref,
                        wr_ref, br_ref, wt_ref, bt_ref, out_ref):
    # new_shared = shared + (RGB_m - shared_m) * sig(1x1(RGB_m - shared_m))
    #                     + (T_m   - shared_m) * sig(1x1(T_m   - shared_m))
    d_rgb = rgbm_ref[...] - sm_ref[...]
    d_t = tm_ref[...] - sm_ref[...]
    g_rgb = _sigmoid(jnp.dot(d_rgb.astype(jnp.bfloat16), wr_ref[...],
                             preferred_element_type=jnp.float32) + br_ref[...])
    g_t = _sigmoid(jnp.dot(d_t.astype(jnp.bfloat16), wt_ref[...],
                           preferred_element_type=jnp.float32) + bt_ref[...])
    out_ref[...] = sh_ref[...] + d_rgb * g_rgb + d_t * g_t


def _fuse_stage2_kernel(nsm_ref, rgbm_ref, tm_ref, rgb_ref, t_ref,
                        wr_ref, br_ref, wt_ref, bt_ref, orgb_ref, ot_ref):
    # new_RGB = RGB + (new_shared_m - RGB_m) * sig(1x1(new_shared_m - RGB_m))
    # new_T   = T   + (new_shared_m - T_m)   * sig(1x1(new_shared_m - T_m))
    d_rgb = nsm_ref[...] - rgbm_ref[...]
    d_t = nsm_ref[...] - tm_ref[...]
    g_rgb = _sigmoid(jnp.dot(d_rgb.astype(jnp.bfloat16), wr_ref[...],
                             preferred_element_type=jnp.float32) + br_ref[...])
    g_t = _sigmoid(jnp.dot(d_t.astype(jnp.bfloat16), wt_ref[...],
                           preferred_element_type=jnp.float32) + bt_ref[...])
    orgb_ref[...] = rgb_ref[...] + d_rgb * g_rgb
    ot_ref[...] = t_ref[...] + d_t * g_t


# ----------------------------------------------------------------------------
# Pallas call wrappers
# ----------------------------------------------------------------------------
def conv3x3_relu(x, w, b, d_rate=1):
    """3x3 conv (padding=d_rate, dilation=d_rate) + bias + ReLU, NHWC.
    x: (N, H, W, Cin) f32, w: (3, 3, Cin, Cout) f32, b: (1, Cout) f32."""
    N, H, W, Cin = x.shape
    Cout = w.shape[-1]
    p = d_rate
    xp = jnp.pad(x, ((0, 0), (p, p), (p, p), (0, 0))).astype(jnp.bfloat16)
    Wp = W + 2 * p
    w9 = w.reshape(9, Cin, Cout).astype(jnp.bfloat16)
    b = b.astype(jnp.float32)

    def row_spec(dy):
        # block size 1 along H => block index == row index, so the vertical
        # tap offset (dy * d_rate) can be folded into the index_map.
        return pl.BlockSpec((None, 1, Wp, Cin),
                            lambda n, i, dy=dy: (n, i + dy * d_rate, 0, 0))

    # TODO(synk): if DMA is still exposed for very wide K, deepen the input
    # pipelining with pipeline_mode=pl.Buffered(3) on the row specs.
    return pl.pallas_call(
        functools.partial(_conv3x3_row_kernel, d_rate=d_rate),
        out_shape=jax.ShapeDtypeStruct((N, H, W, Cout), jnp.float32),
        grid=(N, H),
        in_specs=[row_spec(0), row_spec(1), row_spec(2),
                  pl.BlockSpec((9, Cin, Cout), lambda n, i: (0, 0, 0)),
                  pl.BlockSpec((1, Cout), lambda n, i: (0, 0))],
        out_specs=pl.BlockSpec((None, 1, W, Cout), lambda n, i: (n, i, 0, 0)),
        compiler_params=_compiler_params(("parallel", "parallel")),
    )(xp, xp, xp, w9, b)


def fuse_stage1(rgb_m, t_m, shared_m, shared, wr, br, wt, bt):
    N, M, C = rgb_m.shape
    TM = _choose_tm(M, per_row_bytes=C * 5 * 4)
    act = pl.BlockSpec((None, TM, C), lambda n, m: (n, m, 0))
    mat = pl.BlockSpec((C, C), lambda n, m: (0, 0))
    vec = pl.BlockSpec((1, C), lambda n, m: (0, 0))
    return pl.pallas_call(
        _fuse_stage1_kernel,
        out_shape=jax.ShapeDtypeStruct((N, M, C), jnp.float32),
        grid=(N, pl.cdiv(M, TM)),
        in_specs=[act, act, act, act, mat, vec, mat, vec],
        out_specs=act,
        compiler_params=_compiler_params(("parallel", "parallel")),
    )(rgb_m, t_m, shared_m, shared,
      wr.astype(jnp.bfloat16), br.astype(jnp.float32),
      wt.astype(jnp.bfloat16), bt.astype(jnp.float32))


def fuse_stage2(new_shared_m, rgb_m, t_m, rgb, t, wr, br, wt, bt):
    N, M, C = rgb_m.shape
    TM = _choose_tm(M, per_row_bytes=C * 7 * 4)
    act = pl.BlockSpec((None, TM, C), lambda n, m: (n, m, 0))
    mat = pl.BlockSpec((C, C), lambda n, m: (0, 0))
    vec = pl.BlockSpec((1, C), lambda n, m: (0, 0))
    return pl.pallas_call(
        _fuse_stage2_kernel,
        out_shape=(jax.ShapeDtypeStruct((N, M, C), jnp.float32),
                   jax.ShapeDtypeStruct((N, M, C), jnp.float32)),
        grid=(N, pl.cdiv(M, TM)),
        in_specs=[act, act, act, act, act, mat, vec, mat, vec],
        out_specs=(act, act),
        compiler_params=_compiler_params(("parallel", "parallel")),
    )(new_shared_m, rgb_m, t_m, rgb, t,
      wr.astype(jnp.bfloat16), br.astype(jnp.float32),
      wt.astype(jnp.bfloat16), bt.astype(jnp.float32))


# ----------------------------------------------------------------------------
# Glue: pooling and nearest upsample (memory-bound data movement, plain JAX)
# ----------------------------------------------------------------------------
def _maxpool2x2_ceil(x):
    """MaxPool2d(kernel=2, stride=2, ceil_mode=True), NHWC (for 'M' entries)."""
    N, H, W, C = x.shape
    ph, pw = (-H) % 2, (-W) % 2
    xp = jnp.pad(x, ((0, 0), (0, ph), (0, pw), (0, 0)),
                 constant_values=-jnp.inf)
    return jnp.max(xp.reshape(N, (H + ph) // 2, 2, (W + pw) // 2, 2, C),
                   axis=(2, 4))


def _maxpool_floor(x, k):
    """MaxPool2d(kernel=k, stride=k), default ceil_mode=False (floor)."""
    N, H, W, C = x.shape
    Hc, Wc = (H // k) * k, (W // k) * k
    xc = x[:, :Hc, :Wc, :]
    return jnp.max(xc.reshape(N, Hc // k, k, Wc // k, k, C), axis=(2, 4))


def _nearest_resize(x, H, W):
    """F.interpolate(mode='nearest') to (H, W): src = floor(dst * in / out).
    Handles non-divisible spatial sizes (odd H/W after ceil-mode pooling)."""
    Hs, Ws = x.shape[1], x.shape[2]
    hi = (jnp.arange(H) * Hs) // H
    wi = (jnp.arange(W) * Ws) // W
    return jnp.take(jnp.take(x, hi, axis=1), wi, axis=2)


def msc_forward(x, w, b):
    """MSC: 1x1 conv + ReLU over concat([x, up(pool2(x)), up(pool4(x))]),
    computed without materializing the 3C concat.
    x: (N, H, W, C) f32, w: (3C, C), b: (1, C). Returns (N, H*W, C) f32."""
    N, H, W, C = x.shape
    M = H * W
    u2 = _nearest_resize(_maxpool_floor(x, 2), H, W)
    u4 = _nearest_resize(_maxpool_floor(x, 4), H, W)
    xs = [a.reshape(N, M, C).astype(jnp.bfloat16) for a in (x, u2, u4)]
    ws = [w[i * C:(i + 1) * C].astype(jnp.bfloat16) for i in range(3)]
    b = b.astype(jnp.float32)

    TM = _choose_tm(M, per_row_bytes=C * (3 * 2 + 4))
    act = pl.BlockSpec((None, TM, C), lambda n, m: (n, m, 0))
    mat = pl.BlockSpec((C, C), lambda n, m: (0, 0))
    vec = pl.BlockSpec((1, C), lambda n, m: (0, 0))
    return pl.pallas_call(
        _msc_kernel,
        out_shape=jax.ShapeDtypeStruct((N, M, C), jnp.float32),
        grid=(N, pl.cdiv(M, TM)),
        in_specs=[act, act, act, mat, mat, mat, vec],
        out_specs=act,
        compiler_params=_compiler_params(("parallel", "parallel")),
    )(xs[0], xs[1], xs[2], ws[0], ws[1], ws[2], b)


def make_layers_forward(x, cfg, layer_params, d_rate):
    """Equivalent of make_layers(cfg, ..., d_rate=d_rate) forward, NHWC."""
    pi = 0
    for v in cfg:
        if v == 'M':
            x = _maxpool2x2_ceil(x)
        else:
            p = layer_params[pi]
            pi += 1
            x = conv3x3_relu(x, p["w"], p["b"], d_rate)
    return x


# ----------------------------------------------------------------------------
# Block forward (NHWC end-to-end; NCHW wrapper for PyTorch-style I/O)
# ----------------------------------------------------------------------------
def block_forward(params, cfg, RGB, T, shared, first_block=False, d_rate=1):
    """NHWC in / NHWC out."""
    RGB = make_layers_forward(RGB, cfg, params["rgb_conv"], d_rate)
    T = make_layers_forward(T, cfg, params["t_conv"], d_rate)
    N, H, W, C = RGB.shape
    M = H * W

    if first_block:
        shared_flat = jnp.zeros((N, M, C), jnp.float32)
        shared_m = shared_flat
    else:
        shared_nhwc = make_layers_forward(shared, cfg, params["shared_conv"], d_rate)
        shared_flat = shared_nhwc.reshape(N, M, C)
        shared_m = msc_forward(shared_nhwc, params["shared_fuse_msc"]["w"],
                               params["shared_fuse_msc"]["b"])

    RGB_m = msc_forward(RGB, params["rgb_msc"]["w"], params["rgb_msc"]["b"])
    T_m = msc_forward(T, params["t_msc"]["w"], params["t_msc"]["b"])

    new_shared = fuse_stage1(
        RGB_m, T_m, shared_m, shared_flat,
        params["rgb_fuse_1x1conv"]["w"], params["rgb_fuse_1x1conv"]["b"],
        params["t_fuse_1x1conv"]["w"], params["t_fuse_1x1conv"]["b"])

    new_shared_m = msc_forward(new_shared.reshape(N, H, W, C),
                               params["shared_distribute_msc"]["w"],
                               params["shared_distribute_msc"]["b"])

    new_RGB, new_T = fuse_stage2(
        new_shared_m, RGB_m, T_m, RGB.reshape(N, M, C), T.reshape(N, M, C),
        params["rgb_distribute_1x1conv"]["w"], params["rgb_distribute_1x1conv"]["b"],
        params["t_distribute_1x1conv"]["w"], params["t_distribute_1x1conv"]["b"])

    shp = (N, H, W, C)
    return new_RGB.reshape(shp), new_T.reshape(shp), new_shared.reshape(shp)


def block_forward_nchw(params, cfg, RGB, T, shared, first_block=False, d_rate=1):
    """PyTorch-compatible NCHW in / NCHW out wrapper."""
    to_nhwc = lambda z: jnp.transpose(z, (0, 2, 3, 1))
    to_nchw = lambda z: jnp.transpose(z, (0, 3, 1, 2))
    out = block_forward(params, cfg, to_nhwc(RGB), to_nhwc(T), to_nhwc(shared),
                        first_block=first_block, d_rate=d_rate)
    return tuple(to_nchw(z) for z in out)


# ----------------------------------------------------------------------------
# Deterministic parameter init (PyTorch-like uniform fan-in init)
# ----------------------------------------------------------------------------
def _init_conv(key, kh, kw, cin, cout):
    k_w, k_b = jax.random.split(key)
    bound = 1.0 / ((cin * kh * kw) ** 0.5)
    w = jax.random.uniform(k_w, (kh, kw, cin, cout), jnp.float32, -bound, bound)
    b = jax.random.uniform(k_b, (1, cout), jnp.float32, -bound, bound)
    return {"w": w, "b": b}


def _init_layers(key, cfg, in_channels):
    convs = [v for v in cfg if v != 'M']
    keys = jax.random.split(key, max(len(convs), 1))
    layers, cin = [], in_channels
    for i, v in enumerate(convs):
        layers.append(_init_conv(keys[i], 3, 3, cin, v))
        cin = v
    return layers


def init_block_params(key, cfg, in_channels, first_block=False):
    C = cfg[0]
    params = {}
    keys = iter(jax.random.split(key, 16))
    params["rgb_conv"] = _init_layers(next(keys), cfg, in_channels)
    params["t_conv"] = _init_layers(next(keys), cfg, in_channels)
    if not first_block:
        params["shared_conv"] = _init_layers(next(keys), cfg, in_channels)
    msc_names = ["rgb_msc", "t_msc", "shared_distribute_msc"]
    if not first_block:
        msc_names.append("shared_fuse_msc")
    for nm in msc_names:
        p = _init_conv(next(keys), 1, 1, 3 * C, C)
        params[nm] = {"w": p["w"].reshape(3 * C, C), "b": p["b"]}
    for nm in ["rgb_fuse_1x1conv", "t_fuse_1x1conv",
               "rgb_distribute_1x1conv", "t_distribute_1x1conv"]:
        p = _init_conv(next(keys), 1, 1, C, C)
        params[nm] = {"w": p["w"].reshape(C, C), "b": p["b"]}
    return params


# ----------------------------------------------------------------------------
# Demo
# ----------------------------------------------------------------------------
if __name__ == "__main__":
    key = jax.random.PRNGKey(0)
    cfg = (8, 8)            # make_layers cfg: two 3x3 convs, 8 channels each
    in_channels = 3
    N, H, W = 2, 16, 16
    d_rate = 1
    first_block = False

    kp, kr, kt, ks = jax.random.split(key, 4)
    params = init_block_params(kp, cfg, in_channels, first_block=first_block)

    # PyTorch-style NCHW inputs
    RGB = jax.random.normal(kr, (N, in_channels, H, W), jnp.float32)
    T = jax.random.normal(kt, (N, in_channels, H, W), jnp.float32)
    shared = jax.random.normal(ks, (N, in_channels, H, W), jnp.float32)

    new_RGB, new_T, new_shared = block_forward_nchw(
        params, cfg, RGB, T, shared, first_block=first_block, d_rate=d_rate)
    jax.block_until_ready((new_RGB, new_T, new_shared))

    assert new_RGB.shape == (N, cfg[0], H, W)
    assert new_T.shape == (N, cfg[0], H, W)
    assert new_shared.shape == (N, cfg[0], H, W)
    assert bool(jnp.all(jnp.isfinite(new_RGB)))
    assert bool(jnp.all(jnp.isfinite(new_T)))
    assert bool(jnp.all(jnp.isfinite(new_shared)))
    print("KERNEL_OK")
</pallas_src>

<mosaic_0001>
module attributes {stable_mosaic.version = 11 : i64} {
  func.func @_conv3x3_row_kernel(%arg0: i32, %arg1: i32, %arg2: memref<1x1x18x3xbf16, #tpu.memory_space<vmem>>, %arg3: memref<1x1x18x3xbf16, #tpu.memory_space<vmem>>, %arg4: memref<1x1x18x3xbf16, #tpu.memory_space<vmem>>, %arg5: memref<9x3x8xbf16, #tpu.memory_space<vmem>>, %arg6: memref<1x8xf32, #tpu.memory_space<vmem>>, %arg7: memref<1x1x16x8xf32, #tpu.memory_space<vmem>>) attributes {dimension_semantics = [#tpu.dimension_semantics<parallel>, #tpu.dimension_semantics<parallel>], iteration_bounds = array<i64: 2, 16>, scalar_prefetch = 0 : i64, scratch_operands = 0 : i64, tpu.core_type = #tpu.core_type<tc>, window_params = [{transform_indices = @transform_0, window_bounds = array<i64: 1, 1, 18, 3>}, {transform_indices = @transform_1, window_bounds = array<i64: 1, 1, 18, 3>}, {transform_indices = @transform_2, window_bounds = array<i64: 1, 1, 18, 3>}, {pipeline_mode = #tpu.pipeline_mode<synchronous>, transform_indices = @transform_3, window_bounds = array<i64: 9, 3, 8>}, {pipeline_mode = #tpu.pipeline_mode<synchronous>, transform_indices = @transform_4, window_bounds = array<i64: 1, 8>}, {transform_indices = @transform_5, window_bounds = array<i64: 1, 1, 16, 8>}]} {
    %cst = arith.constant 0.000000e+00 : f32
    %0 = vector.broadcast %cst : f32 to vector<16x8xf32>
    %c0 = arith.constant 0 : index
    %c0_0 = arith.constant 0 : index
    %c0_1 = arith.constant 0 : index
    %c0_2 = arith.constant 0 : index
    %1 = vector.load %arg2[%c0, %c0_0, %c0_1, %c0_2] : memref<1x1x18x3xbf16, #tpu.memory_space<vmem>>, vector<1x1x16x3xbf16>
    %2 = vector.shape_cast %1 : vector<1x1x16x3xbf16> to vector<16x3xbf16>
    %c0_3 = arith.constant 0 : index
    %c0_4 = arith.constant 0 : index
    %c0_5 = arith.constant 0 : index
    %3 = vector.load %arg5[%c0_3, %c0_4, %c0_5] : memref<9x3x8xbf16, #tpu.memory_space<vmem>>, vector<1x3x8xbf16>
    %4 = vector.shape_cast %3 : vector<1x3x8xbf16> to vector<3x8xbf16>
    %cst_6 = arith.constant dense<0.000000e+00> : vector<16x8xf32>
    %5 = tpu.matmul %2, %4, %cst_6 {dimension_numbers = #tpu.dot_dimension_numbers<[1], [0], [0], [1], [0, 0, 1, 1], [], []>} : vector<16x3xbf16>, vector<3x8xbf16>, vector<16x8xf32> -> vector<16x8xf32>
    %6 = arith.addf %0, %5 : vector<16x8xf32>
    %c0_7 = arith.constant 0 : index
    %c0_8 = arith.constant 0 : index
    %c1 = arith.constant 1 : index
    %c0_9 = arith.constant 0 : index
    %7 = vector.load %arg2[%c0_7, %c0_8, %c1, %c0_9] : memref<1x1x18x3xbf16, #tpu.memory_space<vmem>>, vector<1x1x16x3xbf16>
    %8 = vector.shape_cast %7 : vector<1x1x16x3xbf16> to vector<16x3xbf16>
    %c1_10 = arith.constant 1 : index
    %c0_11 = arith.constant 0 : index
    %c0_12 = arith.constant 0 : index
    %9 = vector.load %arg5[%c1_10, %c0_11, %c0_12] : memref<9x3x8xbf16, #tpu.memory_space<vmem>>, vector<1x3x8xbf16>
    %10 = vector.shape_cast %9 : vector<1x3x8xbf16> to vector<3x8xbf16>
    %cst_13 = arith.constant dense<0.000000e+00> : vector<16x8xf32>
    %11 = tpu.matmul %8, %10, %cst_13 {dimension_numbers = #tpu.dot_dimension_numbers<[1], [0], [0], [1], [0, 0, 1, 1], [], []>} : vector<16x3xbf16>, vector<3x8xbf16>, vector<16x8xf32> -> vector<16x8xf32>
    %12 = arith.addf %6, %11 : vector<16x8xf32>
    %c0_14 = arith.constant 0 : index
    %c0_15 = arith.constant 0 : index
    %c2 = arith.constant 2 : index
    %c0_16 = arith.constant 0 : index
    %13 = vector.load %arg2[%c0_14, %c0_15, %c2, %c0_16] : memref<1x1x18x3xbf16, #tpu.memory_space<vmem>>, vector<1x1x16x3xbf16>
    %14 = vector.shape_cast %13 : vector<1x1x16x3xbf16> to vector<16x3xbf16>
    %c2_17 = arith.constant 2 : index
    %c0_18 = arith.constant 0 : index
    %c0_19 = arith.constant 0 : index
    %15 = vector.load %arg5[%c2_17, %c0_18, %c0_19] : memref<9x3x8xbf16, #tpu.memory_space<vmem>>, vector<1x3x8xbf16>
    %16 = vector.shape_cast %15 : vector<1x3x8xbf16> to vector<3x8xbf16>
    %cst_20 = arith.constant dense<0.000000e+00> : vector<16x8xf32>
    %17 = tpu.matmul %14, %16, %cst_20 {dimension_numbers = #tpu.dot_dimension_numbers<[1], [0], [0], [1], [0, 0, 1, 1], [], []>} : vector<16x3xbf16>, vector<3x8xbf16>, vector<16x8xf32> -> vector<16x8xf32>
    %18 = arith.addf %12, %17 : vector<16x8xf32>
    %c0_21 = arith.constant 0 : index
    %c0_22 = arith.constant 0 : index
    %c0_23 = arith.constant 0 : index
    %c0_24 = arith.constant 0 : index
    %19 = vector.load %arg3[%c0_21, %c0_22, %c0_23, %c0_24] : memref<1x1x18x3xbf16, #tpu.memory_space<vmem>>, vector<1x1x16x3xbf16>
    %20 = vector.shape_cast %19 : vector<1x1x16x3xbf16> to vector<16x3xbf16>
    %c3 = arith.constant 3 : index
    %c0_25 = arith.constant 0 : index
    %c0_26 = arith.constant 0 : index
    %21 = vector.load %arg5[%c3, %c0_25, %c0_26] : memref<9x3x8xbf16, #tpu.memory_space<vmem>>, vector<1x3x8xbf16>
    %22 = vector.shape_cast %21 : vector<1x3x8xbf16> to vector<3x8xbf16>
    %cst_27 = arith.constant dense<0.000000e+00> : vector<16x8xf32>
    %23 = tpu.matmul %20, %22, %cst_27 {dimension_numbers = #tpu.dot_dimension_numbers<[1], [0], [0], [1], [0, 0, 1, 1], [], []>} : vector<16x3xbf16>, vector<3x8xbf16>, vector<16x8xf32> -> vector<16x8xf32>
    %24 = arith.addf %18, %23 : vector<16x8xf32>
    %c0_28 = arith.constant 0 : index
    %c0_29 = arith.constant 0 : index
    %c1_30 = arith.constant 1 : index
    %c0_31 = arith.constant 0 : index
    %25 = vector.load %arg3[%c0_28, %c0_29, %c1_30, %c0_31] : memref<1x1x18x3xbf16, #tpu.memory_space<vmem>>, vector<1x1x16x3xbf16>
    %26 = vector.shape_cast %25 : vector<1x1x16x3xbf16> to vector<16x3xbf16>
    %c4 = arith.constant 4 : index
    %c0_32 = arith.constant 0 : index
    %c0_33 = arith.constant 0 : index
    %27 = vector.load %arg5[%c4, %c0_32, %c0_33] : memref<9x3x8xbf16, #tpu.memory_space<vmem>>, vector<1x3x8xbf16>
    %28 = vector.shape_cast %27 : vector<1x3x8xbf16> to vector<3x8xbf16>
    %cst_34 = arith.constant dense<0.000000e+00> : vector<16x8xf32>
    %29 = tpu.matmul %26, %28, %cst_34 {dimension_numbers = #tpu.dot_dimension_numbers<[1], [0], [0], [1], [0, 0, 1, 1], [], []>} : vector<16x3xbf16>, vector<3x8xbf16>, vector<16x8xf32> -> vector<16x8xf32>
    %30 = arith.addf %24, %29 : vector<16x8xf32>
    %c0_35 = arith.constant 0 : index
    %c0_36 = arith.constant 0 : index
    %c2_37 = arith.constant 2 : index
    %c0_38 = arith.constant 0 : index
    %31 = vector.load %arg3[%c0_35, %c0_36, %c2_37, %c0_38] : memref<1x1x18x3xbf16, #tpu.memory_space<vmem>>, vector<1x1x16x3xbf16>
    %32 = vector.shape_cast %31 : vector<1x1x16x3xbf16> to vector<16x3xbf16>
    %c5 = arith.constant 5 : index
    %c0_39 = arith.constant 0 : index
    %c0_40 = arith.constant 0 : index
    %33 = vector.load %arg5[%c5, %c0_39, %c0_40] : memref<9x3x8xbf16, #tpu.memory_space<vmem>>, vector<1x3x8xbf16>
    %34 = vector.shape_cast %33 : vector<1x3x8xbf16> to vector<3x8xbf16>
    %cst_41 = arith.constant dense<0.000000e+00> : vector<16x8xf32>
    %35 = tpu.matmul %32, %34, %cst_41 {dimension_numbers = #tpu.dot_dimension_numbers<[1], [0], [0], [1], [0, 0, 1, 1], [], []>} : vector<16x3xbf16>, vector<3x8xbf16>, vector<16x8xf32> -> vector<16x8xf32>
    %36 = arith.addf %30, %35 : vector<16x8xf32>
    %c0_42 = arith.constant 0 : index
    %c0_43 = arith.constant 0 : index
    %c0_44 = arith.constant 0 : index
    %c0_45 = arith.constant 0 : index
    %37 = vector.load %arg4[%c0_42, %c0_43, %c0_44, %c0_45] : memref<1x1x18x3xbf16, #tpu.memory_space<vmem>>, vector<1x1x16x3xbf16>
    %38 = vector.shape_cast %37 : vector<1x1x16x3xbf16> to vector<16x3xbf16>
    %c6 = arith.constant 6 : index
    %c0_46 = arith.constant 0 : index
    %c0_47 = arith.constant 0 : index
    %39 = vector.load %arg5[%c6, %c0_46, %c0_47] : memref<9x3x8xbf16, #tpu.memory_space<vmem>>, vector<1x3x8xbf16>
    %40 = vector.shape_cast %39 : vector<1x3x8xbf16> to vector<3x8xbf16>
    %cst_48 = arith.constant dense<0.000000e+00> : vector<16x8xf32>
    %41 = tpu.matmul %38, %40, %cst_48 {dimension_numbers = #tpu.dot_dimension_numbers<[1], [0], [0], [1], [0, 0, 1, 1], [], []>} : vector<16x3xbf16>, vector<3x8xbf16>, vector<16x8xf32> -> vector<16x8xf32>
    %42 = arith.addf %36, %41 : vector<16x8xf32>
    %c0_49 = arith.constant 0 : index
    %c0_50 = arith.constant 0 : index
    %c1_51 = arith.constant 1 : index
    %c0_52 = arith.constant 0 : index
    %43 = vector.load %arg4[%c0_49, %c0_50, %c1_51, %c0_52] : memref<1x1x18x3xbf16, #tpu.memory_space<vmem>>, vector<1x1x16x3xbf16>
    %44 = vector.shape_cast %43 : vector<1x1x16x3xbf16> to vector<16x3xbf16>
    %c7 = arith.constant 7 : index
    %c0_53 = arith.constant 0 : index
    %c0_54 = arith.constant 0 : index
    %45 = vector.load %arg5[%c7, %c0_53, %c0_54] : memref<9x3x8xbf16, #tpu.memory_space<vmem>>, vector<1x3x8xbf16>
    %46 = vector.shape_cast %45 : vector<1x3x8xbf16> to vector<3x8xbf16>
    %cst_55 = arith.constant dense<0.000000e+00> : vector<16x8xf32>
    %47 = tpu.matmul %44, %46, %cst_55 {dimension_numbers = #tpu.dot_dimension_numbers<[1], [0], [0], [1], [0, 0, 1, 1], [], []>} : vector<16x3xbf16>, vector<3x8xbf16>, vector<16x8xf32> -> vector<16x8xf32>
    %48 = arith.addf %42, %47 : vector<16x8xf32>
    %c0_56 = arith.constant 0 : index
    %c0_57 = arith.constant 0 : index
    %c2_58 = arith.constant 2 : index
    %c0_59 = arith.constant 0 : index
    %49 = vector.load %arg4[%c0_56, %c0_57, %c2_58, %c0_59] : memref<1x1x18x3xbf16, #tpu.memory_space<vmem>>, vector<1x1x16x3xbf16>
    %50 = vector.shape_cast %49 : vector<1x1x16x3xbf16> to vector<16x3xbf16>
    %c8 = arith.constant 8 : index
    %c0_60 = arith.constant 0 : index
    %c0_61 = arith.constant 0 : index
    %51 = vector.load %arg5[%c8, %c0_60, %c0_61] : memref<9x3x8xbf16, #tpu.memory_space<vmem>>, vector<1x3x8xbf16>
    %52 = vector.shape_cast %51 : vector<1x3x8xbf16> to vector<3x8xbf16>
    %cst_62 = arith.constant dense<0.000000e+00> : vector<16x8xf32>
    %53 = tpu.matmul %50, %52, %cst_62 {dimension_numbers = #tpu.dot_dimension_numbers<[1], [0], [0], [1], [0, 0, 1, 1], [], []>} : vector<16x3xbf16>, vector<3x8xbf16>, vector<16x8xf32> -> vector<16x8xf32>
    %54 = arith.addf %48, %53 : vector<16x8xf32>
    %c0_63 = arith.constant 0 : index
    %c0_64 = arith.constant 0 : index
    %55 = vector.load %arg6[%c0_63, %c0_64] : memref<1x8xf32, #tpu.memory_space<vmem>>, vector<1x8xf32>
    %56 = vector.broadcast %55 : vector<1x8xf32> to vector<16x8xf32>
    %57 = arith.addf %54, %56 : vector<16x8xf32>
    %cst_65 = arith.constant 0.000000e+00 : f32
    %58 = vector.broadcast %cst_65 : f32 to vector<16x8xf32>
    %59 = arith.maximumf %57, %58 : vector<16x8xf32>
    %c0_66 = arith.constant 0 : index
    %c0_67 = arith.constant 0 : index
    %c0_68 = arith.constant 0 : index
    %c0_69 = arith.constant 0 : index
    %60 = vector.load %arg7[%c0_66, %c0_67, %c0_68, %c0_69] : memref<1x1x16x8xf32, #tpu.memory_space<vmem>>, vector<1x1x16x8xf32>
    %61 = vector.shape_cast %60 : vector<1x1x16x8xf32> to vector<16x8xf32>
    %62 = vector.shape_cast %59 : vector<16x8xf32> to vector<1x1x16x8xf32>
    tpu.vector_store %arg7[%c0_66, %c0_67, %c0_68, %c0_69], %62 {strides = array<i32>} : memref<1x1x16x8xf32, #tpu.memory_space<vmem>>, vector<1x1x16x8xf32>,
    return
  }
  func.func @transform_0(%arg0: i32, %arg1: i32) -> (i32, i32, i32, i32) {
    %c0_i32 = arith.constant 0 : i32
    %0 = arith.addi %arg1, %c0_i32 : i32
    %c0_i32_0 = arith.constant 0 : i32
    %c0_i32_1 = arith.constant 0 : i32
    %c0_i32_2 = arith.constant 0 : i32
    return %arg0, %0, %c0_i32_0, %c0_i32_1 : i32, i32, i32, i32
  }
  func.func @transform_1(%arg0: i32, %arg1: i32) -> (i32, i32, i32, i32) {
    %c1_i32 = arith.constant 1 : i32
    %0 = arith.addi %arg1, %c1_i32 : i32
    %c0_i32 = arith.constant 0 : i32
    %c0_i32_0 = arith.constant 0 : i32
    %c0_i32_1 = arith.constant 0 : i32
    return %arg0, %0, %c0_i32, %c0_i32_0 : i32, i32, i32, i32
  }
  func.func @transform_2(%arg0: i32, %arg1: i32) -> (i32, i32, i32, i32) {
    %c2_i32 = arith.constant 2 : i32
    %0 = arith.addi %arg1, %c2_i32 : i32
    %c0_i32 = arith.constant 0 : i32
    %c0_i32_0 = arith.constant 0 : i32
    %c0_i32_1 = arith.constant 0 : i32
    return %arg0, %0, %c0_i32, %c0_i32_0 : i32, i32, i32, i32
  }
  func.func @transform_3(%arg0: i32, %arg1: i32) -> (i32, i32, i32) {
    %c0_i32 = arith.constant 0 : i32
    %c0_i32_0 = arith.constant 0 : i32
    %c0_i32_1 = arith.constant 0 : i32
    %c0_i32_2 = arith.constant 0 : i32
    return %c0_i32, %c0_i32_0, %c0_i32_1 : i32, i32, i32
  }
  func.func @transform_4(%arg0: i32, %arg1: i32) -> (i32, i32) {
    %c0_i32 = arith.constant 0 : i32
    %c0_i32_0 = arith.constant 0 : i32
    %c0_i32_1 = arith.constant 0 : i32
    return %c0_i32, %c0_i32_0 : i32, i32
  }
  func.func @transform_5(%arg0: i32, %arg1: i32) -> (i32, i32, i32, i32) {
    %c0_i32 = arith.constant 0 : i32
    %c0_i32_0 = arith.constant 0 : i32
    %c0_i32_1 = arith.constant 0 : i32
    return %arg0, %arg1, %c0_i32, %c0_i32_0 : i32, i32, i32, i32
  }
}

</mosaic_0001>

<bundles_post_ra>
// kernel: tpu_custom_call.1
= control target key start
LH: loop header
LB: loop body
LE: loop exit
PB: predicated region body
PF: predicated region fallthrough
CT: control target
= control target key end

     0   :  { %s1304_s18 = smov 0   ;;  %s1306_s19 = smov 0   ;;  %s1472_s0 = inlined_call_operand.vmem [shape: bf16[2,18,18,3], index: 0, kind: input, shape index: {}]   ;;  %s1473_s1 = inlined_call_operand.vmem [shape: bf16[2,18,18,3], index: 1, kind: input, shape index: {}]   ;;  %s1474_s2 = inlined_call_operand.vmem [shape: bf16[2,18,18,3], index: 2, kind: input, shape index: {}]   ;;  %s1475_s3 = inlined_call_operand.vmem [shape: bf16[9,3,8], index: 3, kind: input, shape index: {}]   ;;  %s1476_s4 = inlined_call_operand.vmem [shape: f32[1,8], index: 4, kind: input, shape index: {}]   ;;  %s1477_s5 = inlined_call_operand.vmem [shape: f32[2,16,16,8], index: 5, kind: output, shape index: {}]  }
   0x1   :  { %s1308_s20 = smov 0   ;;  %s1310_s21 = smov 0  }
   0x2   :  { %s1312_s22 = smov 0  }
   0x3 LB: > { %s24_s23 = sadd.s32 1, %s1261_s20  ;;  %s27_s24 = sadd.s32 1, %s1265_s21  ;;  %s1269_s22 = sphi %s1312_s22, %s15_s22   ;;  %s1265_s21 = sphi %s1310_s21, %s1481_s21   ;;  %s1261_s20 = sphi %s1308_s20, %s1480_s20   ;;  %s1257_s19 = sphi %s1306_s19, %s1479_s19   ;;  %s1253_s18 = sphi %s1304_s18, %s1478_s18  }
   0x4   : > { %p25_p0 = scmp.ge.s32.totalorder %s24_s23, 16  ;;  %p1063_p1 = scmp.ge.s32.totalorder %s1269_s22, 1 }
   0x5   : > { %p247_p2 = scmp.lt.s32.totalorder %s1269_s22, 33 }
   0x6   : > { %s1483_s23 = smov (%p25_p0, %s24_s23), 0  ;;  %s1485_s24 = smov (!%p25_p0, %s27_s24), %s1265_s21 }
   0x7   : > { %p248_p3 = pnand %p1063_p1, %p247_p2  ;;  %p29_p4 = scmp.ge.s32.totalorder %s1485_s24, 2 }
   0x8   : > { %v1070_v0 = vld [vmem:[%s1475_s3 + $0x2] sm:$0x3] (!%p248_p3)  ;;  %vm375_vm0 = vcmask (!%p248_p3), 1040384   ;;  %vm376_vm1 = vcmask (!%p248_p3), 1041408   ;;  %v1271_v1 = vmov (!%p248_p3), 0.0   ;;  %v1272_v2 = vmov (!%p248_p3), 65535  }
   0x9   : > { %s1487_s24 = smov (%p29_p4, %s1485_s24), 0  ;;  %251 = sbr.rel (%p248_p3) target bundleno = 287 (0x11f), region = 40 }
   0xa   : > { %1119 = vmatprep.subr.bf16.mxu0 (!%p248_p3), %v1271_v1  ;;  %v377_v3 = vsel (!%p248_p3), %vm375_vm0, 4294967295, %v1272_v2  ;;  %1125 = vmatprep.subr.bf16.mxu1 (!%p248_p3), %v1271_v1  ;;  %v346_v4 = vld [vmem:[%s1475_s3] sm:$0x3] (!%p248_p3)  ;;  %p303_p5 = scmp.lt.s32.totalorder (!%p248_p3), %s1257_s19, 1  ;;  %p305_p6 = scmp.lt.s32.totalorder (!%p248_p3), %s1253_s18, 17  ;;  %vm1273_vm2 = vmmov (!%p248_p3), 0  }
   0xb   : > { %v1348_v5 = vsel (!%p248_p3), %vm376_vm1, %v377_v3, 0  ;;  %1121 = vmatprep.mubr.msk.bf16.mxu0 (!%p248_p3), %vm1273_vm2, %v1271_v1  ;;  %1127 = vmatprep.mubr.msk.bf16.mxu1 (!%p248_p3), %vm1273_vm2, %v1271_v1  ;;  %s312_s6 = sadd.s32 (!%p248_p3), 1, %s1253_s18  ;;  %s323_s8 = sadd.s32 (!%p248_p3), 2, %s1253_s18  ;;  %v1078_v8 = vld [vmem:[%s1475_s3 + $0x6] sm:$0x3] (!%p248_p3)  ;;  %vm371_vm3 = vcmask (!%p248_p3), 23552  }
   0xc   : > { %v380_v6 = vand.u32 (!%p248_p3), %v1070_v0, %v1348_v5  ;;  %v426_v7 = vand.u32 (!%p248_p3), %v1348_v5, %v346_v4  ;;  %p315_p7 = scmp.lt.s32.totalorder (!%p248_p3), %s312_s6, 17  ;;  %p326_p8 = scmp.lt.s32.totalorder (!%p248_p3), %s323_s8, 17  ;;  %v541_v11 = vand.u32 (!%p248_p3), %v1078_v8, %v1348_v5  ;;  %v1075_v18 = vld [vmem:[%s1475_s3 + $0x4] sm:$0x3] (!%p248_p3)  ;;  %vm358_vm4 = vsmask.f32 (!%p248_p3), 7424 }
   0xd   : > { %v1085_v22 = vld [vmem:[%s1475_s3 + $0xa] sm:$0x3] (!%p248_p3)  ;;  %v483_v24 = vand.u32 (!%p248_p3), %v1075_v18, %v1348_v5  ;;  %vm475_vm5 = vcmask (!%p248_p3), 1046528   ;;  %v1081_v28 = vld [vmem:[%s1475_s3 + $0x8] sm:$0x3] (!%p248_p3)  ;;  %p336_p9 = scmp.lt.s32.totalorder (!%p248_p3), %s1253_s18, 15 }
   0xe   : > { %1120 = vmatpush3.bf16.msra.mxu0 (!%p248_p3), %v380_v6  ;;  %1126 = vmatpush3.bf16.msra.mxu1 (!%p248_p3), %v426_v7  ;;  %v673_v29 = vand.u32 (!%p248_p3), %v1085_v22, %v1348_v5  ;;  %v1091_v40 = vld [vmem:[%s1475_s3 + $0xe] sm:$0x3] (!%p248_p3)  ;;  %v615_v46 = vand.u32 (!%p248_p3), %v1081_v28, %v1348_v5  ;;  %v1088_v58 = vld [vmem:[%s1475_s3 + $0xc] sm:$0x3] (!%p248_p3)  ;;  %v1095_v0 = vld [vmem:[%s1475_s3 + $0x10] sm:$0x3] (!%p248_p3) }
   0xf   : > { %1131 = vmatprep.subr.bf16.mxu0 (!%p248_p3), %v1271_v1  ;;  %1137 = vmatprep.subr.bf16.mxu1 (!%p248_p3), %v1271_v1  ;;  %v805_v51 = vand.u32 (!%p248_p3), %v1091_v40, %v1348_v5  ;;  %v731_v62 = vand.u32 (!%p248_p3), %v1088_v58, %v1348_v5  ;;  %v863_v4 = vand.u32 (!%p248_p3), %v1095_v0, %v1348_v5  ;;  %vm919_vm6 = vcmask (!%p248_p3), 64512  }
  0x10   : > { %s1489_s19 = smov (!%p303_p5, %s1257_s19), 1  ;;  %s1491_s6 = smov (!%p315_p7, %s312_s6), 17 }
  0x11   : > { %s306_s29 = scalar_select %p305_p6, %s1253_s18, 17 }
  0x12   : > { %s1361_s30 = smul.u32 54, %s1489_s19  ;;  %s1493_s8 = smov (!%p326_p8, %s323_s8), 17 }
  0x13   : > { %s1173_s7 = smul.u32 3, %s306_s29  ;;  %s1495_s18 = smov (!%p336_p9, %s1253_s18), 15 }
  0x14   : > { %s1175_s16 = smul.u32 3, %s1491_s6  ;;  %s1067_s29 = sshll.u32 %s1495_s18, 1 }
  0x15   : > { %s309_s9 = sadd.s32 %s1361_s30, %s1173_s7  ;;  %s1176_s26 = smul.u32 3, %s1493_s8 }
  0x16   : > { %s1064_s12 = sshll.u32 %s309_s9, 2  ;;  %s319_s27 = sadd.s32 %s1175_s16, %s1361_s30 }
  0x17   : > { %s311_s15 = scalar_lea.vmem %s1472_s0, %s1064_s12  ;;  %s1065_s28 = sshll.u32 %s319_s27, 2 }
  0x18   : > { %v344_v9 = vld [vmem:[%s311_s15] sm:$0xf]  ;;  %v345_v10 = vld [vmem:[%s311_s15 + $0x4] sm:$0xf]  ;;  %s330_s6 = sadd.s32 %s1176_s26, %s1361_s30  ;;  %s321_s8 = scalar_lea.vmem %s1473_s1, %s1065_s28 }
  0x19   : > { %v1071_v12 = vcombine.low %v344_v9, %v345_v10  ;;  %v1221_v13 = vld [vmem:[%s311_s15 + $0x8] ss:$0 sps:$4 sm:$0x11]   ;;  %v469_v17 = vld [vmem:[%s311_s15] sm:$0xe]  ;;  %s1066_s11 = sshll.u32 %s330_s6, 2 }
  0x1a   : > { %v367_v16 = vshll.u32 %v1221_v13, 16  ;;  %v1076_v21 = vcombine.low %v469_v17, %v345_v10  ;;  %v477_v25 = vrot.slane %v1221_v13, 1  ;;  %v1223_v26 = vld [vmem:[%s321_s8] sm:$0xff]   ;;  %s1394_s14 = scalar_lea.vmem %s1474_s2, %s1066_s11  ;;  %v1225_v34 = vld [vmem:[%s321_s8 + $0x8] ss:$0 sps:$4 sm:$0x11]  }
  0x1b   : > { %v360_v14 = vshrl.u32 %v1071_v12, 16  ;;  %v362_v15 = vshll.u32 %v1071_v12, 16  ;;  %1128 = vmatmul.mubr.msk.bf16.vlgmr.msra.gmra.mrb[0].mxu1 %vm371_vm3, %v1071_v12  ;;  %v586_v30 = vld [vmem:[%s321_s8] sm:$0xf]  ;;  %v587_v31 = vld [vmem:[%s321_s8 + $0x4] sm:$0xf] }
  0x1c   : > { %1138 = vmatpush3.bf16.msra.mxu1 %v541_v11  ;;  %1139 = vmatprep.mubr.msk.bf16.mxu1 %vm1273_vm2, %v1271_v1  ;;  %v369_v20 = vrot.slane %v367_v16, 1  ;;  %v476_v32 = vrot.slane %v1076_v21, 1  ;;  %v1082_v33 = vcombine.low %v586_v30, %v587_v31  ;;  %v660_v35 = vld [vmem:[%s321_s8] sm:$0xe]  ;;  %v667_v39 = vrot.slane %v1225_v34, 1  ;;  %s1068_s7 = sshll.u32 %s1489_s19, 5 }
  0x1d   : > { %v364_v19 = vrot.slane %v362_v15, 1  ;;  %1149 = vmatprep.subr.bf16.mxu1 %v1271_v1  ;;  %v1086_v36 = vcombine.low %v660_v35, %v587_v31  ;;  %v776_v37 = vld [vmem:[%s1394_s14] sm:$0xf]  ;;  %v777_v41 = vld [vmem:[%s1394_s14 + $0x4] sm:$0xf]  ;;  %v607_v49 = vshll.u32 %v1225_v34, 16  ;;  %s340_s6 = sadd.s32 %s1068_s7, %s1067_s29 }
  0x1e   : > { %v602_v38 = vshll.u32 %v1082_v33, 16  ;;  %v1092_v43 = vcombine.low %v776_v37, %v777_v41  ;;  %v1229_v44 = vld [vmem:[%s1394_s14 + $0x8] ss:$0 sps:$4 sm:$0x11]   ;;  %v478_v45 = vsel %vm475_vm5, %v476_v32, %v477_v25  ;;  %v600_v47 = vshrl.u32 %v1082_v33, 16  ;;  %v1227_v3 = vld [vmem:[%s1394_s14] sm:$0xff]  }
  0x1f   : > { %v365_v23 = vor.u32 %v364_v19, %v360_v14  ;;  %v666_v42 = vrot.slane %v1086_v36, 1  ;;  %v797_v55 = vshll.u32 %v1229_v44, 16  ;;  %v609_v57 = vrot.slane %v607_v49, 1  ;;  %v850_v2 = vld [vmem:[%s1394_s14] sm:$0xe]  ;;  %s1069_s8 = sshll.u32 %s340_s6, 3 }
  0x20   : > { %v604_v48 = vrot.slane %v602_v38, 1  ;;  %v792_v50 = vshll.u32 %v1092_v43, 16  ;;  %v790_v53 = vshrl.u32 %v1092_v43, 16  ;;  %v1096_v6 = vcombine.low %v850_v2, %v777_v41  ;;  %s342_s13 = scalar_lea.vmem %s1477_s5, %s1069_s8 }
  0x21   : > { %v370_v27 = vsel %vm358_vm4, %v365_v23, %v369_v20  ;;  %v668_v52 = vsel %vm475_vm5, %v666_v42, %v667_v39  ;;  %v799_v60 = vrot.slane %v797_v55, 1  ;;  %v857_v8 = vrot.slane %v1229_v44, 1  ;;  %v1098_v55 = vld [vmem:[%s1476_s4] ss:$0 sm:$0xff] }
  0x22   : > { %1122 = vmatmul.mubr.msk.bf16.vlgmr.msra.gmra.mrb[0].mxu0 %vm371_vm3, %v370_v27  ;;  %v794_v54 = vrot.slane %v792_v50, 1  ;;  %v605_v56 = vor.u32 %v604_v48, %v600_v47  ;;  %v856_v7 = vrot.slane %v1096_v6, 1 }
  0x23   : > { %1132 = vmatpush3.bf16.msra.mxu0 %v483_v24  ;;  %1133 = vmatprep.mubr.msk.bf16.mxu0 %vm1273_vm2, %v1271_v1 }
  0x24   : > { %1143 = vmatprep.subr.bf16.mxu0 %v1271_v1  ;;  %1140 = vmatmul.mubr.msk.bf16.vlgmr.msra.gmra.mrb[4].mxu1 %vm371_vm3, %v1223_v26  ;;  %v795_v59 = vor.u32 %v794_v54, %v790_v53  ;;  %v610_v61 = vsel %vm358_vm4, %v605_v56, %v609_v57  ;;  %v858_v9 = vsel %vm475_vm5, %v856_v7, %v857_v8 }
  0x25   : > { %1150 = vmatpush3.bf16.msra.mxu1 %v673_v29  ;;  %1151 = vmatprep.mubr.msk.bf16.mxu1 %vm1273_vm2, %v1271_v1 }
  0x26   : > { %1161 = vmatprep.subr.bf16.mxu1 %v1271_v1  ;;  %v800_v63 = vsel %vm358_vm4, %v795_v59, %v799_v60 }
  0x2a   : > { %1134 = vmatmul.mubr.msk.bf16.vlgmr.msra.gmra.mrb[4].mxu0 %vm371_vm3, %v478_v45 }
  0x2b   : > { %1144 = vmatpush3.bf16.msra.mxu0 %v615_v46  ;;  %1145 = vmatprep.mubr.msk.bf16.mxu0 %vm1273_vm2, %v1271_v1 }
  0x2c   : > { %1155 = vmatprep.subr.bf16.mxu0 %v1271_v1  ;;  %1152 = vmatmul.mubr.msk.bf16.vlgmr.msra.gmra.mrb[8].mxu1 %vm371_vm3, %v668_v52 }
  0x2d   : > { %1162 = vmatpush3.bf16.msra.mxu1 %v805_v51  ;;  %1163 = vmatprep.mubr.msk.bf16.mxu1 %vm1273_vm2, %v1271_v1 }
  0x32   : > { %1146 = vmatmul.mubr.msk.bf16.vlgmr.msra.gmra.mrb[8].mxu0 %vm371_vm3, %v610_v61 }
  0x33   : > { %1156 = vmatpush3.bf16.msra.mxu0 %v731_v62  ;;  %1157 = vmatprep.mubr.msk.bf16.mxu0 %vm1273_vm2, %v1271_v1 }
  0x34   : > { %1167 = vmatprep.subr.bf16.mxu0 %v1271_v1  ;;  %1164 = vmatmul.mubr.msk.bf16.vlgmr.msra.gmra.mrb[12].mxu1 %vm371_vm3, %v800_v63 }
  0x3a   : > { %1158 = vmatmul.mubr.msk.bf16.vlgmr.msra.gmra.mrb[12].mxu0 %vm371_vm3, %v1227_v3 }
  0x3b   : > { %1168 = vmatpush3.bf16.msra.mxu0 %v863_v4  ;;  %1169 = vmatprep.mubr.msk.bf16.mxu0 %vm1273_vm2, %v1271_v1 }
  0x42   : > { %1170 = vmatmul.mubr.msk.bf16.vlgmr.msra.gmra.mrb[16].mxu0 %vm371_vm3, %v858_v9 }
  0xee   : > { %v462_v10 = vpop.f32.mrb[0].mxu1 }
  0xef   : > { %v1129_v11 = vpop.f32.mrb[1].mxu1 }
  0xf0   : > { %v465_v12 = vpop.f32.mrb[2].mxu1 }
  0xf1   : > { %v1130_v13 = vpop.f32.mrb[3].mxu1 }
  0xf5   : > { %v416_v14 = vpop.f32.mrb[0].mxu0 }
  0xf6   : > { %v463_v15 = vadd.f32 %v462_v10, %v416_v14  ;;  %v1123_v5 = vpop.f32.mrb[1].mxu0 }
  0xf7   : > { %v419_v16 = vpop.f32.mrb[2].mxu0  ;;  %v577_v17 = vpop.f32.mrb[4].mxu1 }
  0xf8   : > { %v466_v18 = vadd.f32 %v465_v12, %v419_v16  ;;  %v1124_v19 = vpop.f32.mrb[3].mxu0  ;;  %v1141_v20 = vpop.f32.mrb[5].mxu1 }
  0xf9   : > { %v580_v21 = vpop.f32.mrb[6].mxu1 }
  0xfa   : > { %v1142_v1 = vpop.f32.mrb[7].mxu1 }
  0xfd   : > { %v519_v22 = vpop.f32.mrb[4].mxu0 }
  0xfe   : > { %v526_v23 = vadd.f32 %v519_v22, %v463_v15  ;;  %v1135_v24 = vpop.f32.mrb[5].mxu0 }
  0xff   : > { %v522_v25 = vpop.f32.mrb[6].mxu0  ;;  %v709_v26 = vpop.f32.mrb[8].mxu1 }
 0x100   : > { %v527_v27 = vadd.f32 %v522_v25, %v466_v18  ;;  %v584_v28 = vadd.f32 %v577_v17, %v526_v23  ;;  %v1136_v29 = vpop.f32.mrb[7].mxu0  ;;  %v1153_v30 = vpop.f32.mrb[9].mxu1 }
 0x101   : > { %v712_v31 = vpop.f32.mrb[10].mxu1 }
 0x102   : > { %v585_v32 = vadd.f32 %v580_v21, %v527_v27  ;;  %v1154_v33 = vpop.f32.mrb[11].mxu1 }
 0x105   : > { %v651_v34 = vpop.f32.mrb[8].mxu0 }
 0x106   : > { %v658_v35 = vadd.f32 %v651_v34, %v584_v28  ;;  %v1147_v36 = vpop.f32.mrb[9].mxu0 }
 0x107   : > { %v654_v37 = vpop.f32.mrb[10].mxu0  ;;  %v841_v38 = vpop.f32.mrb[12].mxu1 }
 0x108   : > { %v659_v39 = vadd.f32 %v654_v37, %v585_v32  ;;  %v716_v40 = vadd.f32 %v709_v26, %v658_v35  ;;  %v1148_v41 = vpop.f32.mrb[11].mxu0  ;;  %v1165_v42 = vpop.f32.mrb[13].mxu1 }
 0x109   : > { %v844_v43 = vpop.f32.mrb[14].mxu1 }
 0x10a   : > { %v717_v44 = vadd.f32 %v712_v31, %v659_v39  ;;  %v1166_v45 = vpop.f32.mrb[15].mxu1 }
 0x10d   : > { %v767_v46 = vpop.f32.mrb[12].mxu0 }
 0x10e   : > { %v774_v47 = vadd.f32 %v767_v46, %v716_v40  ;;  %v1159_v48 = vpop.f32.mrb[13].mxu0 }
 0x10f   : > { %v770_v49 = vpop.f32.mrb[14].mxu0 }
 0x110   : > { %v775_v50 = vadd.f32 %v770_v49, %v717_v44  ;;  %v848_v51 = vadd.f32 %v841_v38, %v774_v47  ;;  %v1160_v52 = vpop.f32.mrb[15].mxu0 }
 0x112   : > { %v849_v53 = vadd.f32 %v844_v43, %v775_v50 }
 0x115   : > { %v899_v54 = vpop.f32.mrb[16].mxu0 }
 0x116   : > { %v906_v56 = vadd.f32 %v899_v54, %v848_v51  ;;  %v1171_v57 = vpop.f32.mrb[17].mxu0 }
 0x117   : > { %v902_v58 = vpop.f32.mrb[18].mxu0 }
 0x118   : > { %v915_v59 = vadd.f32 %v1098_v55, %v906_v56  ;;  %v907_v60 = vadd.f32 %v902_v58, %v849_v53  ;;  %v1172_v61 = vpop.f32.mrb[19].mxu0 }
 0x11a   : > { %v917_v62 = vmax.f32 %v915_v59, 0.0  ;;  %v916_v63 = vadd.f32 %v1098_v55, %v907_v60 }
 0x11c   : > { %920 = vst.msk [vmem:[%s342_s13] sm:$0xff] %vm919_vm6, %v917_v62  ;;  %v918_v0 = vmax.f32 %v916_v63, 0.0 }
 0x11e   : > { %921 = vst.msk [vmem:[%s342_s13 + $0x8] sm:$0xff] %vm919_vm6, %v918_v0 }
 0x11f PF: > { %s15_s22 = sadd.s32 1, %s1269_s22   ;;  %s1478_s18 = smov %s1261_s20 }
 0x120   : > { %p12_p10 = scmp.ge.s32.totalorder %s15_s22, 34   ;;  %s1479_s19 = smov %s1265_s21 }
 0x121   : > { %s1480_s20 = smov %s1483_s23  ;;  %s1481_s21 = smov %s1487_s24 }
 0x122   :  { %14 = sbr.rel (!%p12_p10) target bundleno = 3 (0x3), region = 84 }

</bundles_post_ra>
